<compile_context>
chip_gen: v7x
topology: tpu7x:2x2x1
jax: 0.10.0
libtpu: 0.0.40
codegen_flags: <defaults>
</compile_context>

<pallas_src>
import functools

import jax
import jax.numpy as jnp
from jax.experimental import pallas as pl
from jax.experimental.pallas import tpu as pltpu


def _round_up(x, m):
    return (x + m - 1) // m * m


# ----------------------------- Pallas kernel --------------------------------
def _inverted_residual_kernel(x_ref, w1_ref, t1_ref, w2_ref, t2_ref, o_ref, *,
                              residual):
    """Fused (1x1 conv + BN + HardSwish) x2 [+ residual], pixels on lanes.

    x_ref : (1, C_in,  T)   activation tile (T = spatial tile, lane axis)
    w1_ref: (C_mid, C_in)   BN-scale-folded expansion weight
    t1_ref: (C_mid, 1)      folded BN shift
    w2_ref: (C_out, C_mid)  BN-scale-folded projection weight
    t2_ref: (C_out, 1)      folded BN shift
    o_ref : (1, C_out, T)
    """
    x = x_ref[0]                                              # (C_in, T)

    # Expansion 1x1 conv (MXU matmul, f32 accumulation) + shift + HardSwish.
    h = jnp.dot(w1_ref[...], x, preferred_element_type=jnp.float32)
    h = h + t1_ref[...]
    h = h * jnp.clip(h + 3.0, 0.0, 6.0) * (1.0 / 6.0)         # HardSwish

    # Projection ("pointhwise") 1x1 conv + shift + HardSwish.
    h = h.astype(w2_ref.dtype)                                # bf16 path stays bf16
    y = jnp.dot(w2_ref[...], h, preferred_element_type=jnp.float32)
    y = y + t2_ref[...]
    y = y * jnp.clip(y + 3.0, 0.0, 6.0) * (1.0 / 6.0)         # HardSwish

    if residual:
        y = y + x.astype(jnp.float32)

    o_ref[0] = y.astype(o_ref.dtype)


# ------------------------------ tile selection --------------------------------
def _choose_spatial_tile(hw, n, c_in, c_mid, c_out, budget_bytes=20 << 20):
    """Largest lane tile (multiple of 128) whose f32 working set fits budget."""
    def vmem_need(t):
        # double-buffered x/out tiles + (double-buffered) weights/shifts
        # + live f32 intermediates (h and y).
        return (4 * t * (2 * c_in + 2 * c_out + c_mid + c_out)
                + 8 * (c_in * c_mid + c_mid * c_out + c_mid + c_out))

    tile = min(_round_up(hw, 128), 2048)
    while tile > 128 and vmem_need(tile) > budget_bytes:
        tile -= 128
    # v7x has two TensorCores; keep >= 2 parallel grid steps when data allows.
    if n * pl.cdiv(_round_up(hw, 128), tile) < 2 and tile > 128:
        tile = max(128, (tile // 2) // 128 * 128)
    return tile


# ------------------------------- wrapper -------------------------------------
def inverted_residual_block(x_nchw, params, *, stride, output_feature, alpha=1,
                            tile_hw=None):
    n, c_in, h, w = x_nchw.shape
    w1, s1, t1 = params["w1"], params["s1"], params["t1"]
    w2, s2, t2 = params["w2"], params["s2"], params["t2"]
    c_mid, c_out = w1.shape[1], w2.shape[1]

    residual = (stride == 1) and (c_mid == int(output_feature * alpha))
    if residual:
        # PyTorch would raise on `x + output` otherwise.
        assert c_out == c_in, "residual add requires matching channel counts"

    # Fold BN scale into the conv weights; transpose so channels sit on
    # sublanes and pixels on lanes inside the kernel.
    act_dt = x_nchw.dtype
    w1_t = (w1 * s1[None, :]).T.astype(act_dt)                # (c_mid, c_in)
    w2_t = (w2 * s2[None, :]).T.astype(act_dt)                # (c_out, c_mid)
    t1_c = t1.reshape(c_mid, 1).astype(jnp.float32)
    t2_c = t2.reshape(c_out, 1).astype(jnp.float32)

    hw = h * w
    if tile_hw is None:
        tile_hw = _choose_spatial_tile(hw, n, c_in, c_mid, c_out)
    hw_p = _round_up(hw, tile_hw)

    x3d = x_nchw.reshape(n, c_in, hw)                         # free (no transpose)
    if hw_p != hw:
        x3d = jnp.pad(x3d, ((0, 0), (0, 0), (0, hw_p - hw)))

    kern = functools.partial(_inverted_residual_kernel, residual=residual)
    grid = (n, hw_p // tile_hw)

    # NOTE: the constant-index weight/shift specs are fetched once and stay
    # VMEM-resident across the whole grid; single-buffering them would save a
    # little more VMEM but is unnecessary at these channel sizes.
    out3d = pl.pallas_call(
        kern,
        out_shape=jax.ShapeDtypeStruct((n, c_out, hw_p), act_dt),
        grid_spec=pltpu.PrefetchScalarGridSpec(
            num_scalar_prefetch=0,
            grid=grid,
            in_specs=[
                pl.BlockSpec((1, c_in, tile_hw), lambda b, i: (b, 0, i)),  # x
                pl.BlockSpec((c_mid, c_in), lambda b, i: (0, 0)),          # W1'
                pl.BlockSpec((c_mid, 1), lambda b, i: (0, 0)),             # t1
                pl.BlockSpec((c_out, c_mid), lambda b, i: (0, 0)),         # W2'
                pl.BlockSpec((c_out, 1), lambda b, i: (0, 0)),             # t2
            ],
            out_specs=pl.BlockSpec((1, c_out, tile_hw), lambda b, i: (b, 0, i)),
        ),
        compiler_params=pltpu.CompilerParams(
            dimension_semantics=("parallel", "parallel"),
            vmem_limit_bytes=48 << 20),
    )(x3d, w1_t, t1_c, w2_t, t2_c)

    out = out3d[:, :, :hw] if hw_p != hw else out3d
    return out.reshape(n, c_out, h, w)


# ----------------------- deterministic parameter init ------------------------
def init_params(key, c_in, expansion, output_feature, alpha=1, eps=1e-5):
    c_mid = int(c_in * expansion)
    c_out = int(output_feature * alpha)
    ks = jax.random.split(key, 12)

    def conv_bn(kw, kb, kg, kbe, krm, krv, cin, cout):
        w = 0.2 * jax.random.normal(kw, (cin, cout), jnp.float32)      # 1x1 conv
        b = 0.1 * jax.random.normal(kb, (cout,), jnp.float32)          # conv bias
        gamma = 1.0 + 0.1 * jax.random.normal(kg, (cout,), jnp.float32)
        beta = 0.1 * jax.random.normal(kbe, (cout,), jnp.float32)
        rmean = 0.1 * jax.random.normal(krm, (cout,), jnp.float32)
        rvar = 1.0 + 0.5 * jax.random.uniform(krv, (cout,), jnp.float32)
        scale = gamma / jnp.sqrt(rvar + eps)
        shift = (b - rmean) * scale + beta
        return w, scale, shift

    w1, s1, t1 = conv_bn(*ks[0:6], c_in, c_mid)
    w2, s2, t2 = conv_bn(*ks[6:12], c_mid, c_out)
    return dict(w1=w1, s1=s1, t1=t1, w2=w2, s2=s2, t2=t2)


# ------------------------------ pure-JAX reference ---------------------------
def reference(x_nchw, params, residual):
    n, c, h, w = x_nchw.shape
    x2 = jnp.transpose(x_nchw, (0, 2, 3, 1)).reshape(-1, c)
    hsw = lambda v: v * jnp.clip(v + 3.0, 0.0, 6.0) / 6.0
    # BN-scale folding is algebraically identical to (x@W)*s.
    w1f = params["w1"] * params["s1"][None, :]
    w2f = params["w2"] * params["s2"][None, :]
    h1 = hsw(x2 @ w1f + params["t1"][None, :])
    y = hsw(h1 @ w2f + params["t2"][None, :])
    if residual:
        y = y + x2
    c_out = y.shape[-1]
    return y.reshape(n, h, w, c_out).transpose(0, 3, 1, 2)


# ---------------------------------- main --------------------------------------
if __name__ == "__main__":
    key = jax.random.PRNGKey(0)
    kx, kp_a, kp_b = jax.random.split(key, 3)

    N, C_IN, H, W = 2, 8, 16, 16
    x = jax.random.normal(kx, (N, C_IN, H, W), jnp.float32)

    # Config A: expansion=2, output_feature=8 -> c_mid(16) != out*alpha(8)
    #           => no residual; exercises channel expand + squeeze.
    params_a = init_params(kp_a, C_IN, expansion=2, output_feature=8, alpha=1)
    out_a = jax.block_until_ready(
        inverted_residual_block(x, params_a, stride=1, output_feature=8, alpha=1))

    # Config B: expansion=1, output_feature=8 -> residual branch taken.
    params_b = init_params(kp_b, C_IN, expansion=1, output_feature=8, alpha=1)
    out_b = jax.block_until_ready(
        inverted_residual_block(x, params_b, stride=1, output_feature=8, alpha=1))

    ref_a = reference(x, params_a, residual=False)
    ref_b = reference(x, params_b, residual=True)
    assert out_a.shape == (N, 8, H, W) and out_b.shape == (N, 8, H, W)
    assert jnp.allclose(out_a, ref_a, atol=1e-4, rtol=1e-4), \
        float(jnp.max(jnp.abs(out_a - ref_a)))
    assert jnp.allclose(out_b, ref_b, atol=1e-4, rtol=1e-4), \
        float(jnp.max(jnp.abs(out_b - ref_b)))

    print("KERNEL_OK")
</pallas_src>

<mosaic_0001>
module attributes {stable_mosaic.version = 11 : i64} {
  func.func @_inverted_residual_kernel(%arg0: i32, %arg1: i32, %arg2: memref<1x8x256xf32, #tpu.memory_space<vmem>>, %arg3: memref<16x8xf32, #tpu.memory_space<vmem>>, %arg4: memref<16x1xf32, #tpu.memory_space<vmem>>, %arg5: memref<8x16xf32, #tpu.memory_space<vmem>>, %arg6: memref<8x1xf32, #tpu.memory_space<vmem>>, %arg7: memref<1x8x256xf32, #tpu.memory_space<vmem>>) attributes {dimension_semantics = [#tpu.dimension_semantics<parallel>, #tpu.dimension_semantics<parallel>], iteration_bounds = array<i64: 2, 1>, scalar_prefetch = 0 : i64, scratch_operands = 0 : i64, tpu.core_type = #tpu.core_type<tc>, window_params = [{transform_indices = @transform_0, window_bounds = array<i64: 1, 8, 256>}, {pipeline_mode = #tpu.pipeline_mode<synchronous>, transform_indices = @transform_1, window_bounds = array<i64: 16, 8>}, {pipeline_mode = #tpu.pipeline_mode<synchronous>, transform_indices = @transform_2, window_bounds = array<i64: 16, 1>}, {pipeline_mode = #tpu.pipeline_mode<synchronous>, transform_indices = @transform_3, window_bounds = array<i64: 8, 16>}, {pipeline_mode = #tpu.pipeline_mode<synchronous>, transform_indices = @transform_4, window_bounds = array<i64: 8, 1>}, {transform_indices = @transform_5, window_bounds = array<i64: 1, 8, 256>}]} {
    %c0 = arith.constant 0 : index
    %c0_0 = arith.constant 0 : index
    %c0_1 = arith.constant 0 : index
    %0 = vector.load %arg2[%c0, %c0_0, %c0_1] : memref<1x8x256xf32, #tpu.memory_space<vmem>>, vector<1x8x256xf32>
    %1 = vector.shape_cast %0 : vector<1x8x256xf32> to vector<8x256xf32>
    %c0_2 = arith.constant 0 : index
    %c0_3 = arith.constant 0 : index
    %2 = vector.load %arg3[%c0_2, %c0_3] : memref<16x8xf32, #tpu.memory_space<vmem>>, vector<16x8xf32>
    %cst = arith.constant dense<0.000000e+00> : vector<16x256xf32>
    %3 = tpu.matmul %2, %1, %cst {dimension_numbers = #tpu.dot_dimension_numbers<[1], [0], [0], [1], [0, 0, 1, 1], [], []>} : vector<16x8xf32>, vector<8x256xf32>, vector<16x256xf32> -> vector<16x256xf32>
    %c0_4 = arith.constant 0 : index
    %c0_5 = arith.constant 0 : index
    %4 = vector.load %arg4[%c0_4, %c0_5] : memref<16x1xf32, #tpu.memory_space<vmem>>, vector<16x1xf32>
    %5 = vector.broadcast %4 : vector<16x1xf32> to vector<16x256xf32>
    %6 = arith.addf %3, %5 : vector<16x256xf32>
    %cst_6 = arith.constant 3.000000e+00 : f32
    %7 = vector.broadcast %cst_6 : f32 to vector<16x256xf32>
    %8 = arith.addf %6, %7 : vector<16x256xf32>
    %cst_7 = arith.constant 0.000000e+00 : f32
    %cst_8 = arith.constant 6.000000e+00 : f32
    %9 = vector.broadcast %cst_7 : f32 to vector<16x256xf32>
    %10 = arith.maximumf %9, %8 : vector<16x256xf32>
    %11 = vector.broadcast %cst_8 : f32 to vector<16x256xf32>
    %12 = arith.minimumf %11, %10 : vector<16x256xf32>
    %13 = arith.mulf %6, %12 : vector<16x256xf32>
    %cst_9 = arith.constant 0.166666672 : f32
    %14 = vector.broadcast %cst_9 : f32 to vector<16x256xf32>
    %15 = arith.mulf %13, %14 : vector<16x256xf32>
    %c0_10 = arith.constant 0 : index
    %c0_11 = arith.constant 0 : index
    %16 = vector.load %arg5[%c0_10, %c0_11] : memref<8x16xf32, #tpu.memory_space<vmem>>, vector<8x16xf32>
    %cst_12 = arith.constant dense<0.000000e+00> : vector<8x256xf32>
    %17 = tpu.matmul %16, %15, %cst_12 {dimension_numbers = #tpu.dot_dimension_numbers<[1], [0], [0], [1], [0, 0, 1, 1], [], []>} : vector<8x16xf32>, vector<16x256xf32>, vector<8x256xf32> -> vector<8x256xf32>
    %c0_13 = arith.constant 0 : index
    %c0_14 = arith.constant 0 : index
    %18 = vector.load %arg6[%c0_13, %c0_14] : memref<8x1xf32, #tpu.memory_space<vmem>>, vector<8x1xf32>
    %19 = vector.broadcast %18 : vector<8x1xf32> to vector<8x256xf32>
    %20 = arith.addf %17, %19 : vector<8x256xf32>
    %cst_15 = arith.constant 3.000000e+00 : f32
    %21 = vector.broadcast %cst_15 : f32 to vector<8x256xf32>
    %22 = arith.addf %20, %21 : vector<8x256xf32>
    %cst_16 = arith.constant 0.000000e+00 : f32
    %cst_17 = arith.constant 6.000000e+00 : f32
    %23 = vector.broadcast %cst_16 : f32 to vector<8x256xf32>
    %24 = arith.maximumf %23, %22 : vector<8x256xf32>
    %25 = vector.broadcast %cst_17 : f32 to vector<8x256xf32>
    %26 = arith.minimumf %25, %24 : vector<8x256xf32>
    %27 = arith.mulf %20, %26 : vector<8x256xf32>
    %cst_18 = arith.constant 0.166666672 : f32
    %28 = vector.broadcast %cst_18 : f32 to vector<8x256xf32>
    %29 = arith.mulf %27, %28 : vector<8x256xf32>
    %c0_19 = arith.constant 0 : index
    %c0_20 = arith.constant 0 : index
    %c0_21 = arith.constant 0 : index
    %30 = vector.load %arg7[%c0_19, %c0_20, %c0_21] : memref<1x8x256xf32, #tpu.memory_space<vmem>>, vector<1x8x256xf32>
    %31 = vector.shape_cast %30 : vector<1x8x256xf32> to vector<8x256xf32>
    %32 = vector.shape_cast %29 : vector<8x256xf32> to vector<1x8x256xf32>
    tpu.vector_store %arg7[%c0_19, %c0_20, %c0_21], %32 {strides = array<i32>} : memref<1x8x256xf32, #tpu.memory_space<vmem>>, vector<1x8x256xf32>,
    return
  }
  func.func @transform_0(%arg0: i32, %arg1: i32) -> (i32, i32, i32) {
    %c0_i32 = arith.constant 0 : i32
    %c0_i32_0 = arith.constant 0 : i32
    return %arg0, %c0_i32, %arg1 : i32, i32, i32
  }
  func.func @transform_1(%arg0: i32, %arg1: i32) -> (i32, i32) {
    %c0_i32 = arith.constant 0 : i32
    %c0_i32_0 = arith.constant 0 : i32
    %c0_i32_1 = arith.constant 0 : i32
    return %c0_i32, %c0_i32_0 : i32, i32
  }
  func.func @transform_2(%arg0: i32, %arg1: i32) -> (i32, i32) {
    %c0_i32 = arith.constant 0 : i32
    %c0_i32_0 = arith.constant 0 : i32
    %c0_i32_1 = arith.constant 0 : i32
    return %c0_i32, %c0_i32_0 : i32, i32
  }
  func.func @transform_3(%arg0: i32, %arg1: i32) -> (i32, i32) {
    %c0_i32 = arith.constant 0 : i32
    %c0_i32_0 = arith.constant 0 : i32
    %c0_i32_1 = arith.constant 0 : i32
    return %c0_i32, %c0_i32_0 : i32, i32
  }
  func.func @transform_4(%arg0: i32, %arg1: i32) -> (i32, i32) {
    %c0_i32 = arith.constant 0 : i32
    %c0_i32_0 = arith.constant 0 : i32
    %c0_i32_1 = arith.constant 0 : i32
    return %c0_i32, %c0_i32_0 : i32, i32
  }
  func.func @transform_5(%arg0: i32, %arg1: i32) -> (i32, i32, i32) {
    %c0_i32 = arith.constant 0 : i32
    %c0_i32_0 = arith.constant 0 : i32
    return %arg0, %c0_i32, %arg1 : i32, i32, i32
  }
}

</mosaic_0001>

<bundles_post_ra>
// kernel: tpu_custom_call.1
= control target key start
LH: loop header
LB: loop body
LE: loop exit
PB: predicated region body
PF: predicated region fallthrough
CT: control target
= control target key end

     0   :  { %10 = vsyncpa [#allocation3], 0  ;;  %s885_s0 = inlined_call_operand.vmem [shape: f32[2,8,256], index: 0, kind: input, shape index: {}]   ;;  %s886_s1 = inlined_call_operand.vmem [shape: f32[16,8], index: 1, kind: input, shape index: {}]   ;;  %s887_s2 = inlined_call_operand.vmem [shape: f32[16,1], index: 2, kind: input, shape index: {}]   ;;  %s888_s3 = inlined_call_operand.vmem [shape: f32[8,16], index: 3, kind: input, shape index: {}]   ;;  %s889_s4 = inlined_call_operand.vmem [shape: f32[8,1], index: 4, kind: input, shape index: {}]   ;;  %s890_s5 = inlined_call_operand.hbm [shape: f32[2,8,256], index: 5, kind: output, shape index: {}]  }
   0x1   :  { %12 = vsyncpa [#allocation3 + $0x1], 0  ;;  %s755_s18 = smov 0   ;;  %s757_s19 = smov 0  }
   0x2   :  { %s759_s20 = smov 0   ;;  %s761_s21 = smov 0  }
   0x3   :  { %s763_s22 = smov 0   ;;  %s765_s23 = smov 0  }
   0x4 LB: > { %s561_s24 = sadd.s32 4294967295, %s720_s23   ;;  %s562_s25 = sadd.s32 4294967294, %s720_s23   ;;  %s720_s23 = sphi %s765_s23, %s18_s23   ;;  %s716_s22 = sphi %s763_s22, %s897_s22   ;;  %s712_s21 = sphi %s761_s21, %s896_s21   ;;  %s708_s20 = sphi %s759_s20, %s895_s20   ;;  %s704_s19 = sphi %s757_s19, %s894_s19   ;;  %s700_s18 = sphi %s755_s18, %s893_s18  }
   0x5   : > { %s30_s26 = sadd.s32 1, %s716_s22  ;;  %s151_s27 = sadd.s32 1, %s708_s20 }
   0x6   : > { %p32_p0 = scmp.ge.s32.totalorder %s30_s26, 2  ;;  %p161_p1 = scmp.ne.s32.totalorder %s708_s20, %s704_s19 }
   0x7   : > { %p162_p2 = scmp.eq.s32.totalorder %s561_s24, 1  ;;  %p167_p3 = scmp.ne.s32.totalorder %s704_s19, %s700_s18 }
   0x8   : > { %s899_s26 = smov (%p32_p0, %s30_s26), 0  ;;  %p168_p5 = scmp.eq.s32.totalorder %s562_s25, 1 }
   0x9   : > { %p795_p4 = por %p162_p2, %p161_p1  ;;  %s146_s29 = ssub.s32 %s716_s22, %s899_s26 }
   0xa   : > { %p565_p6 = scmp.ge.s32.totalorder %s720_s23, 1  ;;  %p149_p7 = scmp.eq.s32.totalorder %s146_s29, 0 }
   0xb   : > { %p802_p8 = por %p168_p5, %p167_p3  ;;  %p211_p9 = scmp.lt.s32.totalorder %s720_s23, 3 }
   0xc   : > { %s808_s6 = scalar_select %p149_p7, %s708_s20, %s151_s27  }
   0xd   : > { %p212_p10 = pnand %p565_p6, %p211_p9 }
   0xe   : > { %p244_p11 = scmp.lt.s32.totalorder (!%p212_p10), %s712_s21, 1  ;;  %v722_v0 = vmov (!%p212_p10), 0.0   ;;  %v723_v1 = vmov (!%p212_p10), 0   ;;  %v258_v2 = vld [vmem:[%s887_s2] sm:$0xff] (!%p212_p10)  ;;  %v259_v3 = vld [vmem:[%s887_s2 + $0x8] sm:$0xff] (!%p212_p10)  ;;  %vm270_vm0 = vcmask (!%p212_p10), 64512  }
   0xf   : > { %215 = sbr.rel (%p212_p10) target bundleno = 503 (0x1f7), region = 40  ;;  %341 = vmatprep.mubr.f32.mxu0 (!%p212_p10), %v722_v0  ;;  %640 = vset.pattern.permute.xlu0 (!%p212_p10), %v723_v1  ;;  %v256_v6 = vld [vmem:[%s886_s1] sm:$0xff] (!%p212_p10)  ;;  %v257_v7 = vld [vmem:[%s886_s1 + $0x8] sm:$0xff] (!%p212_p10)  ;;  %vm381_vm1 = vcmask (!%p212_p10), 130048   ;;  %s578_s11 = sshll.u32 (!%p212_p10), %s712_s21, 8 }
  0x10   : > { %262 = vperm.xlu0 (!%p212_p10), %640, %v258_v2   ;;  %449 = vmatprep.mubr.f32.mxu1 (!%p212_p10), %v722_v0  ;;  %v375_v8 = vld [vmem:[%s889_s4] sm:$0xff] (!%p212_p10)  ;;  %s838_s16 = scalar_lea.hbm (!%p212_p10), %s890_s5, %s578_s11 }
  0x11   : > { %641 = vset.pattern.permute.xlu1 (!%p212_p10), %v723_v1  ;;  %v374_v41 = vld [vmem:[%s888_s3] sm:$0xff] (!%p212_p10) }
  0x12   : > { %378 = vperm.xlu1 (!%p212_p10), %641, %v375_v8  }
  0x14   : > { %267 = vperm.xlu0 (!%p212_p10), %640, %v259_v3  }
  0x16   : > { %s245_s9 = scalar_select %p244_p11, %s712_s21, 1 }
  0x17   : > { %s724_s21 = smov [#allocation2]  }
  0x18   : > { %s577_s12 = sshll.u32 %s245_s9, 4  ;;  %s240_s9 = sand.u32 1, %s704_s19  }
  0x19   : > { %s251_s15 = scalar_lea.vmem %s885_s0, %s577_s12  ;;  %s566_s10 = sshll.u32 %s240_s9, 4 }
  0x1a   : > { %v255_v4 = vld [vmem:[%s251_s15 + $0x8] sm:$0xff]  ;;  %v254_v5 = vld [vmem:[%s251_s15] sm:$0xff]  ;;  %s242_s12 = scalar_lea.vmem [#allocation2], %s566_s10  ;;  %s469_s17 = scalar_lea.sflag [#allocation3], %s240_s9 }
  0x1b   : > { %277 = vmatprep.subr.mxu0 %v255_v4  ;;  %s485_s13 = sshll.u32 %s242_s12, 4  ;;  %s646_s25 = sshll.u32 %s724_s21, 4  ;;  %s840_s13 = int_to_ptr.vmem [resolvable:$true] %s485_s13  ;;  %s647_s25 = int_to_ptr.vmem [resolvable:$false] %s646_s25 }
  0x1c   : > { %278 = vmatpush1.msra.mxu0 %v254_v5  ;;  %s642_s24 = scalar_lea.vmem %s840_s13, 256  ;;  %s648_s27 = scalar_lea.vmem %s647_s25, 512 }
  0x1d   : > { %569 = vmatmul.mubr.msk.f32.vlgmr.msra.gmra.mrb[0].mxu0 %vm270_vm0, %v256_v6  ;;  %p643_p12 = scmp.ne.s32.totalorder %s840_s13, %s642_s24  ;;  %p649_p1 = scmp.lt.s32.totalorder %s840_s13, %s647_s25 }
  0x1e   : > { %347 = vmatprep.mubr.f32.mxu0 %v722_v0  ;;  %p650_p2 = scmp.lt.s32.totalorder %s648_s27, %s642_s24 }
  0x1f   : > { %p644_p13 = pnand %p643_p12, %p795_p4 }
  0x20   : > { %p651_p3 = por %p650_p2, %p649_p1 }
  0x21   : > { %570 = vmatmul.mubr.msk.f32.gmra.mrb[2].mxu0 %vm270_vm0, %v257_v7  ;;  %p645_p0 = pneg %p644_p13 }
  0x23   : > { %p652_p5 = pnand %p651_p3, %p645_p0 }
  0x8f   : > { %v263_v9 = vpop.permute.xlu0 %262 }
  0x91   : > { %v379_v42 = vpop.permute.xlu1 %378 }
  0x93   : > { %v268_v15 = vpop.permute.xlu0 %267 }
  0xf0   : > { %v343_v10 = vpop.f32.mrb[0].mxu0 }
  0xf1   : > { %v344_v11 = vadd.f32 %v343_v10, %v263_v9  ;;  %v345_v12 = vpop.f32.mrb[1].mxu0 }
  0xf2   : > { %v346_v13 = vadd.f32 %v345_v12, %v263_v9 }
  0xf3   : > { %v354_v14 = vadd.f32 3.0, %v344_v11 }
  0xf4   : > { %v355_v16 = vadd.f32 3.0, %v346_v13  ;;  %v349_v17 = vpop.f32.mrb[2].mxu0 }
  0xf5   : > { %v358_v18 = vmax.f32 %v354_v14, 0.0  ;;  %v350_v19 = vadd.f32 %v349_v17, %v268_v15  ;;  %v351_v20 = vpop.f32.mrb[3].mxu0 }
  0xf6   : > { %v359_v21 = vmax.f32 %v355_v16, 0.0  ;;  %v352_v22 = vadd.f32 %v351_v20, %v268_v15 }
  0xf7   : > { %v362_v23 = vmin.f32 %v358_v18, 6.0  ;;  %v356_v24 = vadd.f32 3.0, %v350_v19 }
  0xf8   : > { %v363_v25 = vmin.f32 %v359_v21, 6.0  ;;  %v357_v26 = vadd.f32 3.0, %v352_v22 }
  0xf9   : > { %v360_v27 = vmax.f32 %v356_v24, 0.0  ;;  %v366_v29 = vmul.f32 %v362_v23, %v344_v11 }
  0xfa   : > { %v361_v28 = vmax.f32 %v357_v26, 0.0  ;;  %v367_v32 = vmul.f32 %v363_v25, %v346_v13 }
  0xfb   : > { %v364_v30 = vmin.f32 %v360_v27, 6.0  ;;  %v370_v35 = vmul.f32 0.16666667, %v366_v29 }
  0xfc   : > { %v365_v31 = vmin.f32 %v361_v28, 6.0  ;;  %v371_v37 = vmul.f32 0.16666667, %v367_v32 }
  0xfd   : > { %v368_v33 = vmul.f32 %v364_v30, %v350_v19 }
  0xfe   : > { %v369_v34 = vmul.f32 %v365_v31, %v352_v22 }
  0xff   : > { %v372_v36 = vmul.f32 0.16666667, %v368_v33 }
 0x100   : > { %v373_v38 = vmul.f32 0.16666667, %v369_v34 }
 0x101   : > { %v581_v39 = vpack.c.bf16 %v372_v36, %v370_v35 }
 0x102   : > { %v579_v40 = vpack.c.bf16 %v373_v38, %v371_v37 }
 0x104   : > { %580 = vmatprep.subr.bf16.mxu1 %v579_v40 }
 0x105   : > { %582 = vmatpush1.bf16.msra.mxu1 %v581_v39 }
 0x108   : > { %571 = vmatmul.mubr.msk.f32.vlgmr.msra.gmra.mrb[0].mxu1 %vm381_vm1, %v374_v41 }
 0x1db   : > { %v451_v43 = vpop.f32.mrb[0].mxu1 }
 0x1dc   : > { %v452_v44 = vadd.f32 %v451_v43, %v379_v42  ;;  %v453_v45 = vpop.f32.mrb[1].mxu1 }
 0x1dd   : > { %v454_v46 = vadd.f32 %v453_v45, %v379_v42 }
 0x1de   : > { %v456_v47 = vadd.f32 3.0, %v452_v44 }
 0x1df   : > { %v457_v48 = vadd.f32 3.0, %v454_v46 }
 0x1e0   : > { %v458_v49 = vmax.f32 %v456_v47, 0.0 }
 0x1e1   : > { %v459_v50 = vmax.f32 %v457_v48, 0.0 }
 0x1e2   : > { %v460_v51 = vmin.f32 %v458_v49, 6.0 }
 0x1e3   : > { %v461_v52 = vmin.f32 %v459_v50, 6.0 }
 0x1e4   : > { %v462_v53 = vmul.f32 %v460_v51, %v452_v44 }
 0x1e5   : > { %v463_v54 = vmul.f32 %v461_v52, %v454_v46 }
 0x1e6   : > { %v464_v55 = vmul.f32 0.16666667, %v462_v53 }
 0x1e7   : > { %v465_v56 = vmul.f32 0.16666667, %v463_v54 }
 0x1e8   : > { %466 = vst [vmem:[%s242_s12] sm:$0xff] %v464_v55 }
 0x1e9   : > { %467 = vst [vmem:[%s242_s12 + $0x8] sm:$0xff] %v465_v56 }
 0x1ea   : > { %655 = shalt.err (!%p652_p5)
}
 0x1eb   : > { %s656_s29 = scalar_lea.hbm %s838_s16, 256  ;;  %s660_s9 = scalar_lea.hbm %s890_s5, 512 }
 0x1ec   : > { %p657_p6 = scmp.ne.s32.totalorder %s838_s16, %s656_s29  ;;  %p661_p10 = scmp.lt.u32.totalorder %s838_s16, %s890_s5 }
 0x1ed   : > { %p662_p11 = scmp.lt.u32.totalorder %s660_s9, %s656_s29  ;;  %p664_p13 = scmp.lt.u32.totalorder %s656_s29, %s838_s16 }
 0x1ee   : > { %p658_p7 = pnand %p657_p6, %p795_p4 }
 0x1ef   : > { %p663_p12 = por %p662_p11, %p661_p10 }
 0x1f0   : > { %p659_p9 = pneg %p658_p7 }
 0x1f1   : > { %p665_p0 = por %p664_p13, %p663_p12 }
 0x1f3   : > { %p666_p1 = pnand %p665_p0, %p659_p9 }
 0x1f5   : > { %669 = shalt.err (!%p666_p1)
}
 0x1f6   : > { %583 = dma.vmem_to_hbm [thread:$0]  (%p795_p4), %s840_s13, 256, %s838_s16, %s469_s17  }
 0x1f7 PF: > { %p589_p2 = scmp.ge.s32.totalorder %s720_s23, 2  ;;  %s497_s12 = sand.u32 1, %s700_s18  }
 0x1f8   : > { %s498_s14 = scalar_lea.sflag [#allocation3], %s497_s12 }
 0x1f9   : > { %p586_p3 = pnand %p589_p2, %p802_p8 }
 0x1fb   : > { %695 = dma.done.wait (!%p586_p3), %s498_s14, 256  }
 0x1fc   : > { %697 = vsyncadd (!%p586_p3), %s498_s14, 4294967040  ;;  %s18_s23 = sadd.s32 1, %s720_s23   ;;  %s893_s18 = smov %s704_s19 }
 0x1fd   : > { %p15_p5 = scmp.ge.s32.totalorder %s18_s23, 4   ;;  %s894_s19 = smov %s708_s20 }
 0x1fe   : > { %s895_s20 = smov %s808_s6  ;;  %s896_s21 = smov %s716_s22 }
 0x1ff   : > { %s897_s22 = smov %s899_s26  ;;  %17 = sbr.rel (!%p15_p5) target bundleno = 4 (0x4), region = 75 }
 0x206   :  { %503 = vsyncpa [#allocation3], 1 }
 0x207   :  { %505 = vsyncpa [#allocation3 + $0x1], 1 }

</bundles_post_ra>
